<compile_context>
chip_gen: v7x
topology: tpu7x:2x2x1
jax: 0.10.0
libtpu: 0.0.40
codegen_flags: <defaults>
</compile_context>

<pallas_src>
import functools

import jax
import jax.numpy as jnp
import numpy as np
from jax.experimental import pallas as pl
from jax.experimental.pallas import tpu as pltpu

D_IN = 10
D_OUT = 2
HIDDEN = 16
NUM_NODES = 24
CONV_NUMBER = 3          # conv1 -> relu -> (conv_number-2) x conv3/relu -> conv2
LANES = 128              # TPU lane width; every packed block is 128 lanes wide
N_PAD = 128              # node dim padded to a full MXU tile (review: "ideally 128")
BIAS_ROWS = 8            # sublane-aligned f32 bias operand

EDGE_INDEX = np.array(
    [[18, 18, 18, 18, 18, 19, 19, 19, 20, 20, 21, 21, 21, 21, 21, 22, 22, 22,
      22, 23, 23, 23, 23, 19, 20, 21, 22, 23, 0, 1, 2, 3, 4, 5, 6, 7, 8, 9,
      10, 11, 12, 13, 14, 15, 16, 17],
     [19, 20, 21, 22, 23, 0, 1, 2, 3, 4, 5, 6, 7, 8, 9, 10, 11, 12, 13, 14,
      15, 16, 17, 18, 18, 18, 18, 18, 19, 19, 19, 20, 20, 21, 21, 21, 21, 21,
      22, 22, 22, 22, 23, 23, 23, 23]],
    dtype=np.int32)


def build_normalized_adjacency(edge_index, num_nodes):
    """Dense GCN propagation matrix D^{-1/2}(A + I)D^{-1/2} (PyG GCNConv)."""
    src = np.concatenate([edge_index[0], np.arange(num_nodes)])
    dst = np.concatenate([edge_index[1], np.arange(num_nodes)])
    deg = np.zeros(num_nodes, dtype=np.float32)
    np.add.at(deg, dst, 1.0)
    dinv = np.where(deg > 0, 1.0 / np.sqrt(deg), 0.0).astype(np.float32)
    a_hat = np.zeros((num_nodes, num_nodes), dtype=np.float32)
    # message passing: out[dst] += norm * x[src]  =>  A_hat[dst, src] = norm
    np.add.at(a_hat, (dst, src), dinv[src] * dinv[dst])
    return a_hat


def build_param_slab(a_hat, params, conv_number):
    """Pack A_hat + all needed weights into ONE bf16 [R, 128] slab.

    A_hat is zero-padded to a full [128, 128] tile (node dim padded to 128);
    each weight is zero-padded to [128, 128] so the kernel contracts over the
    full 128 lanes of the running [128, 128] activation. Biases go into a
    separate small f32 [8, 128] operand (one row per layer).
    Only the parameters actually used by `conv_number` are packed.
    """
    n = a_hat.shape[0]
    a_blk = np.zeros((N_PAD, LANES), np.float32)
    a_blk[:n, :n] = a_hat

    wblocks, woff = [], {}

    def add_w(name, arr):
        woff[name] = LANES * (1 + len(wblocks))       # A block occupies rows 0..127
        blk = np.zeros((LANES, LANES), np.float32)
        a = np.asarray(arr, np.float32)
        blk[:a.shape[0], :a.shape[1]] = a
        wblocks.append(blk)

    bias_np = np.zeros((BIAS_ROWS, LANES), np.float32)
    brow = {}

    def add_b(name, arr):
        brow[name] = len(brow)
        a = np.asarray(arr, np.float32).reshape(-1)
        bias_np[brow[name], :a.shape[0]] = a

    if conv_number == 1:
        add_w("w4", params["w4"]); add_b("b4", params["b4"])
        plan_names = [("w4", "b4", False)]
    else:
        add_w("w1", params["w1"]); add_b("b1", params["b1"])
        if conv_number >= 3:                          # skip w3/b3 when unused
            add_w("w3", params["w3"]); add_b("b3", params["b3"])
        add_w("w2", params["w2"]); add_b("b2", params["b2"])
        plan_names = ([("w1", "b1", True)]
                      + [("w3", "b3", True)] * (conv_number - 2)
                      + [("w2", "b2", False)])

    plan = tuple((woff[w], brow[b], relu) for w, b, relu in plan_names)
    slab_np = np.concatenate([a_blk] + wblocks, axis=0)
    slab = jnp.asarray(slab_np).astype(jnp.bfloat16)      # pre-cast: bf16 DMA
    bias = jnp.asarray(bias_np)                           # small f32 operand
    return slab, bias, plan


def _net2_kernel(plan, slab_ref, bias_ref, x_ref, o_ref):
    # Normalized adjacency: full [128,128] bf16 tile, no slicing, no cast.
    a = slab_ref[0:N_PAD, :]

    h = x_ref[...]                                  # [128, 128] bf16, zero-padded
    acc = None

    for w_off, b_row, relu in plan:                 # static unroll
        w = slab_ref[w_off:w_off + LANES, :]        # bf16 weight tile, read in place
        hw = jnp.dot(h, w, preferred_element_type=jnp.float32)            # MXU
        acc = jnp.dot(a, hw.astype(jnp.bfloat16),
                      preferred_element_type=jnp.float32)                 # MXU
        acc = acc + bias_ref[b_row:b_row + 1, :]    # [1,128] f32 bias, broadcast add
        if relu:                                    # relu <=> not the last layer
            acc = jnp.maximum(acc, 0.0)
            h = acc.astype(jnp.bfloat16)
        # F.dropout(training=False) is the identity at inference time.

    # log_softmax specialised for 2 classes: explicit column slices, no
    # cross-lane axis reduction over the 126/128-padded vreg; exp/log -> EUP.
    h0 = acc[:, 0:1]
    h1 = acc[:, 1:2]
    m = jnp.maximum(h0, h1)
    lse = m + jnp.log(jnp.exp(h0 - m) + jnp.exp(h1 - m))
    o_ref[...] = acc - lse   # lane-dense [128,128] store; caller slices rows/cols


@functools.partial(jax.jit, static_argnames=("plan",))
def net2_forward(x, slab, bias, *, plan):
    """Run the whole Net2 forward in one grid-less, fully jitted pallas_call."""
    # TODO(synk): if this forward is called for many graphs, add a leading
    # batch grid axis (dimension_semantics=("parallel",)) stacking samples'
    # padded node rows, to fill the 256-wide MXU on v6e/v7x and use v7x's
    # second TensorCore; a single 24-node graph cannot.
    n, d = x.shape
    x_pad = jnp.pad(x.astype(jnp.bfloat16), ((0, N_PAD - n), (0, LANES - d)))
    out_pad = pl.pallas_call(
        functools.partial(_net2_kernel, plan),
        out_shape=jax.ShapeDtypeStruct((N_PAD, LANES), jnp.float32),
        in_specs=[pl.BlockSpec(memory_space=pltpu.MemorySpace.VMEM),
                  pl.BlockSpec(memory_space=pltpu.MemorySpace.VMEM),
                  pl.BlockSpec(memory_space=pltpu.MemorySpace.VMEM)],
        out_specs=pl.BlockSpec(memory_space=pltpu.MemorySpace.VMEM),
    )(slab, bias, x_pad)
    return out_pad[:n, :D_OUT]


def _glorot(key, fan_in, fan_out):
    limit = float(np.sqrt(6.0 / (fan_in + fan_out)))
    return jax.random.uniform(key, (fan_in, fan_out), jnp.float32, -limit, limit)


def _reference_forward(x, a_hat, params, conv_number):
    """Pure-numpy f32 reference of Net2.forward (eval mode)."""
    def gcn(h, w, b):
        return a_hat @ (h @ w) + b
    if conv_number == 1:
        h = gcn(x, params["w4"], params["b4"])
    else:
        h = np.maximum(gcn(x, params["w1"], params["b1"]), 0.0)
        for _ in range(conv_number - 2):
            h = np.maximum(gcn(h, params["w3"], params["b3"]), 0.0)
        h = gcn(h, params["w2"], params["b2"])
    m = h.max(axis=1, keepdims=True)
    z = h - m
    return z - np.log(np.exp(z).sum(axis=1, keepdims=True))


if __name__ == "__main__":
    key = jax.random.PRNGKey(0)
    kx, k1, k2, k3, k4 = jax.random.split(key, 5)

    # Node features (what ../data/tr_x.npy would hold): [num_nodes, D_in]
    x = jax.random.normal(kx, (NUM_NODES, D_IN), jnp.float32)

    # Deterministic GCNConv parameters (glorot weights, zero bias), PyG shapes.
    params = {
        "w1": np.asarray(_glorot(k1, D_IN, HIDDEN)),
        "b1": np.zeros((1, HIDDEN), np.float32),
        "w2": np.asarray(_glorot(k2, HIDDEN, D_OUT)),
        "b2": np.zeros((1, D_OUT), np.float32),
        "w3": np.asarray(_glorot(k3, HIDDEN, HIDDEN)),
        "b3": np.zeros((1, HIDDEN), np.float32),
        "w4": np.asarray(_glorot(k4, D_IN, D_OUT)),
        "b4": np.zeros((1, D_OUT), np.float32),
    }

    a_hat = build_normalized_adjacency(EDGE_INDEX, NUM_NODES)
    slab, bias, plan = build_param_slab(a_hat, params, CONV_NUMBER)

    out = net2_forward(x, slab, bias, plan=plan)
    out = np.asarray(jax.block_until_ready(out))

    assert out.shape == (NUM_NODES, D_OUT)
    # rows of log_softmax must exponentiate to a probability distribution
    assert np.allclose(np.exp(out).sum(axis=1), 1.0, atol=1e-4)
    # match a pure-numpy f32 reference (loose tolerance: bf16 MXU operands)
    ref = _reference_forward(np.asarray(x), a_hat, params, CONV_NUMBER)
    assert np.allclose(out, ref, atol=0.1), float(np.abs(out - ref).max())
    print("KERNEL_OK")
</pallas_src>

<mosaic_0001>
module attributes {stable_mosaic.version = 11 : i64} {
  func.func @_net2_kernel(%arg0: memref<512x128xbf16, #tpu.memory_space<vmem>>, %arg1: memref<8x128xf32, #tpu.memory_space<vmem>>, %arg2: memref<128x128xbf16, #tpu.memory_space<vmem>>, %arg3: memref<128x128xf32, #tpu.memory_space<vmem>>) attributes {dimension_semantics = [], scalar_prefetch = 0 : i64, scratch_operands = 0 : i64, tpu.core_type = #tpu.core_type<tc>} {
    %c0 = arith.constant 0 : index
    %c0_0 = arith.constant 0 : index
    %0 = vector.load %arg0[%c0, %c0_0] : memref<512x128xbf16, #tpu.memory_space<vmem>>, vector<128x128xbf16>
    %c0_1 = arith.constant 0 : index
    %c0_2 = arith.constant 0 : index
    %1 = vector.load %arg2[%c0_1, %c0_2] : memref<128x128xbf16, #tpu.memory_space<vmem>>, vector<128x128xbf16>
    %c128 = arith.constant 128 : index
    %c0_3 = arith.constant 0 : index
    %2 = vector.load %arg0[%c128, %c0_3] : memref<512x128xbf16, #tpu.memory_space<vmem>>, vector<128x128xbf16>
    %cst = arith.constant dense<0.000000e+00> : vector<128x128xf32>
    %3 = tpu.matmul %1, %2, %cst {dimension_numbers = #tpu.dot_dimension_numbers<[1], [0], [0], [1], [0, 0, 1, 1], [], []>} : vector<128x128xbf16>, vector<128x128xbf16>, vector<128x128xf32> -> vector<128x128xf32>
    %4 = arith.truncf %3 : vector<128x128xf32> to vector<128x128xbf16>
    %cst_4 = arith.constant dense<0.000000e+00> : vector<128x128xf32>
    %5 = tpu.matmul %0, %4, %cst_4 {dimension_numbers = #tpu.dot_dimension_numbers<[1], [0], [0], [1], [0, 0, 1, 1], [], []>} : vector<128x128xbf16>, vector<128x128xbf16>, vector<128x128xf32> -> vector<128x128xf32>
    %c0_5 = arith.constant 0 : index
    %c0_6 = arith.constant 0 : index
    %6 = vector.load %arg1[%c0_5, %c0_6] : memref<8x128xf32, #tpu.memory_space<vmem>>, vector<1x128xf32>
    %7 = vector.broadcast %6 : vector<1x128xf32> to vector<128x128xf32>
    %8 = arith.addf %5, %7 : vector<128x128xf32>
    %cst_7 = arith.constant 0.000000e+00 : f32
    %9 = vector.broadcast %cst_7 : f32 to vector<128x128xf32>
    %10 = arith.maximumf %8, %9 : vector<128x128xf32>
    %11 = arith.truncf %10 : vector<128x128xf32> to vector<128x128xbf16>
    %c256 = arith.constant 256 : index
    %c0_8 = arith.constant 0 : index
    %12 = vector.load %arg0[%c256, %c0_8] : memref<512x128xbf16, #tpu.memory_space<vmem>>, vector<128x128xbf16>
    %cst_9 = arith.constant dense<0.000000e+00> : vector<128x128xf32>
    %13 = tpu.matmul %11, %12, %cst_9 {dimension_numbers = #tpu.dot_dimension_numbers<[1], [0], [0], [1], [0, 0, 1, 1], [], []>} : vector<128x128xbf16>, vector<128x128xbf16>, vector<128x128xf32> -> vector<128x128xf32>
    %14 = arith.truncf %13 : vector<128x128xf32> to vector<128x128xbf16>
    %cst_10 = arith.constant dense<0.000000e+00> : vector<128x128xf32>
    %15 = tpu.matmul %0, %14, %cst_10 {dimension_numbers = #tpu.dot_dimension_numbers<[1], [0], [0], [1], [0, 0, 1, 1], [], []>} : vector<128x128xbf16>, vector<128x128xbf16>, vector<128x128xf32> -> vector<128x128xf32>
    %c1 = arith.constant 1 : index
    %c0_11 = arith.constant 0 : index
    %16 = vector.load %arg1[%c1, %c0_11] : memref<8x128xf32, #tpu.memory_space<vmem>>, vector<1x128xf32>
    %17 = vector.broadcast %16 : vector<1x128xf32> to vector<128x128xf32>
    %18 = arith.addf %15, %17 : vector<128x128xf32>
    %cst_12 = arith.constant 0.000000e+00 : f32
    %19 = vector.broadcast %cst_12 : f32 to vector<128x128xf32>
    %20 = arith.maximumf %18, %19 : vector<128x128xf32>
    %21 = arith.truncf %20 : vector<128x128xf32> to vector<128x128xbf16>
    %c384 = arith.constant 384 : index
    %c0_13 = arith.constant 0 : index
    %22 = vector.load %arg0[%c384, %c0_13] : memref<512x128xbf16, #tpu.memory_space<vmem>>, vector<128x128xbf16>
    %cst_14 = arith.constant dense<0.000000e+00> : vector<128x128xf32>
    %23 = tpu.matmul %21, %22, %cst_14 {dimension_numbers = #tpu.dot_dimension_numbers<[1], [0], [0], [1], [0, 0, 1, 1], [], []>} : vector<128x128xbf16>, vector<128x128xbf16>, vector<128x128xf32> -> vector<128x128xf32>
    %24 = arith.truncf %23 : vector<128x128xf32> to vector<128x128xbf16>
    %cst_15 = arith.constant dense<0.000000e+00> : vector<128x128xf32>
    %25 = tpu.matmul %0, %24, %cst_15 {dimension_numbers = #tpu.dot_dimension_numbers<[1], [0], [0], [1], [0, 0, 1, 1], [], []>} : vector<128x128xbf16>, vector<128x128xbf16>, vector<128x128xf32> -> vector<128x128xf32>
    %c2 = arith.constant 2 : index
    %c0_16 = arith.constant 0 : index
    %26 = vector.load %arg1[%c2, %c0_16] : memref<8x128xf32, #tpu.memory_space<vmem>>, vector<1x128xf32>
    %27 = vector.broadcast %26 : vector<1x128xf32> to vector<128x128xf32>
    %28 = arith.addf %25, %27 : vector<128x128xf32>
    %29 = vector.extract_strided_slice %28 {offsets = [0, 0], sizes = [128, 1], strides = [1, 1]} : vector<128x128xf32> to vector<128x1xf32>
    %30 = vector.extract_strided_slice %28 {offsets = [0, 1], sizes = [128, 1], strides = [1, 1]} : vector<128x128xf32> to vector<128x1xf32>
    %31 = arith.maximumf %29, %30 : vector<128x1xf32>
    %32 = arith.subf %29, %31 : vector<128x1xf32>
    %33 = math.exp %32 : vector<128x1xf32>
    %34 = arith.subf %30, %31 : vector<128x1xf32>
    %35 = math.exp %34 : vector<128x1xf32>
    %36 = arith.addf %33, %35 : vector<128x1xf32>
    %37 = math.log %36 : vector<128x1xf32>
    %38 = arith.addf %31, %37 : vector<128x1xf32>
    %39 = vector.broadcast %38 : vector<128x1xf32> to vector<128x128xf32>
    %40 = arith.subf %28, %39 : vector<128x128xf32>
    %c0_17 = arith.constant 0 : index
    %c0_18 = arith.constant 0 : index
    %41 = vector.load %arg3[%c0_17, %c0_18] : memref<128x128xf32, #tpu.memory_space<vmem>>, vector<128x128xf32>
    tpu.vector_store %arg3[%c0_17, %c0_18], %40 {strides = array<i32>} : memref<128x128xf32, #tpu.memory_space<vmem>>, vector<128x128xf32>,
    return
  }
}

</mosaic_0001>

<bundles_post_ra>
// kernel: net2_forward.1
= control target key start
LH: loop header
LB: loop body
LE: loop exit
PB: predicated region body
PF: predicated region fallthrough
CT: control target
= control target key end

     0   :  { %8 = vsyncpa [#allocation3], 0  ;;  %s2002_s12 = smov [#allocation2]   ;;  %s2401_s0 = inlined_call_operand.hbm [shape: bf16[512,128], index: 0, kind: input, shape index: {}]   ;;  %s2402_s1 = inlined_call_operand.vmem [shape: f32[8,128], index: 1, kind: input, shape index: {}]   ;;  %s2403_s2 = inlined_call_operand.vmem [shape: bf16[128,128], index: 2, kind: input, shape index: {}]   ;;  %s2404_s3 = inlined_call_operand.vmem [shape: f32[128,128], index: 3, kind: output, shape index: {}]  }
   0x1   :  { %s14_s13 = sshll.u32 %s2002_s12, 4  ;;  %s1978_s16 = scalar_lea.hbm %s2401_s0, 4096  ;;  %s15_s13 = int_to_ptr.vmem [resolvable:$true] %s14_s13 }
   0x2   :  { %p1979_p0 = scmp.ne.s32.totalorder %s2401_s0, %s1978_s16  ;;  %p1982_p1 = scmp.lt.u32.totalorder %s1978_s16, %s2401_s0 }
   0x4   :  { %p1984_p2 = pnand %p1982_p1, %p1979_p0 }
   0x6   :  { %1987 = shalt.err (!%p1984_p2)
}
   0x7   :  { %s1988_s21 = scalar_lea.vmem %s15_s13, 4096  ;;  %p1993_p4 = scmp.lt.s32.totalorder %s15_s13, %s15_s13 }
   0x8   :  { %p1989_p3 = scmp.ne.s32.totalorder %s15_s13, %s1988_s21  ;;  %p1994_p5 = scmp.lt.s32.totalorder %s1988_s21, %s1988_s21 }
   0xa   :  { %p1995_p6 = por %p1994_p5, %p1993_p4 }
   0xc   :  { %p1996_p7 = pnand %p1995_p6, %p1989_p3 }
   0xe   :  { %1999 = shalt.err (!%p1996_p7)
}
   0xf   :  { %s2003_s22 = smov 64   ;;  %s2004_s23 = smov 4  }
  0x10   :  { %20 = dma.hbm_to_vmem [thread:$0]  %s2401_s0, 4096, %s15_s13, [#allocation3], %s2003_s22, %s2003_s22, %s2004_s23  }
  0x11   :  { %2000 = dma.done.wait [#allocation3], 4096  }
  0x12   :  { %2001 = vsyncadd [#allocation3], 4294963200  ;;  %v1842_v0 = vld [vmem:[#allocation2 + $0x40] sm:$0xff]   ;;  %v1843_v1 = vld [vmem:[#allocation2 + $0x48] sm:$0xff]   ;;  %s2005_s19 = smov 127  }
  0x13   :  { %1642 = vmatprep.subr.bf16.mxu0 %v1842_v0  ;;  %v1844_v2 = vld [vmem:[#allocation2 + $0x50] sm:$0xff]   ;;  %v1845_v3 = vld [vmem:[#allocation2 + $0x58] sm:$0xff]   ;;  %v1850_v4 = vld [vmem:[%s2403_s2] sm:$0xff]  }
  0x14   :  { %1643 = vmatpush3.bf16.msra.mxu0 %v1842_v0  ;;  %1658 = vmatprep.mubr.bf16.mxu0 %v1850_v4  ;;  %v1846_v5 = vld [vmem:[#allocation2 + $0x60] sm:$0xff]   ;;  %v1847_v6 = vld [vmem:[#allocation2 + $0x68] sm:$0xff]   ;;  %v1848_v7 = vld [vmem:[#allocation2 + $0x70] sm:$0xff]  }
  0x15   :  { %1644 = vmatprep.subr.bf16.mxu0 %v1843_v1  ;;  %v1849_v8 = vld [vmem:[#allocation2 + $0x78] sm:$0xff]   ;;  %v1851_v9 = vld [vmem:[%s2403_s2 + $0x8] sm:$0xff]   ;;  %v1852_v10 = vld [vmem:[%s2403_s2 + $0x10] sm:$0xff]  }
  0x16   :  { %v1853_v11 = vld [vmem:[%s2403_s2 + $0x18] sm:$0xff]   ;;  %v1854_v12 = vld [vmem:[%s2403_s2 + $0x20] sm:$0xff]   ;;  %v1855_v13 = vld [vmem:[%s2403_s2 + $0x28] sm:$0xff]  }
  0x17   :  { %v1856_v14 = vld [vmem:[%s2403_s2 + $0x30] sm:$0xff]   ;;  %v1857_v15 = vld [vmem:[%s2403_s2 + $0x38] sm:$0xff]   ;;  %v2064_v16 = vld [vmem:[#allocation2] sm:$0xff]  }
  0x18   :  { %1645 = vmatpush3.bf16.msra.mxu0 %v1843_v1  ;;  %1690 = vmatprep.mubr.bf16.mxu1 %v2064_v16  ;;  %v1866_v17 = vld [vmem:[#allocation2 + $0x80] sm:$0xff]   ;;  %v1867_v18 = vld [vmem:[#allocation2 + $0x88] sm:$0xff]   ;;  %v1868_v19 = vld [vmem:[#allocation2 + $0x90] sm:$0xff]  }
  0x19   :  { %1646 = vmatprep.subr.bf16.mxu0 %v1844_v2  ;;  %v1869_v20 = vld [vmem:[#allocation2 + $0x98] sm:$0xff]   ;;  %v1870_v21 = vld [vmem:[#allocation2 + $0xa0] sm:$0xff]   ;;  %v1871_v22 = vld [vmem:[#allocation2 + $0xa8] sm:$0xff]  }
  0x1a   :  { %v2067_v47 = vld [vmem:[#allocation2 + $0x8] sm:$0xff]   ;;  %v2069_v48 = vld [vmem:[#allocation2 + $0x10] sm:$0xff]   ;;  %v2073_v49 = vld [vmem:[#allocation2 + $0x18] sm:$0xff]  }
  0x1b   :  { %v2075_v50 = vld [vmem:[#allocation2 + $0x20] sm:$0xff]   ;;  %v2079_v51 = vld [vmem:[#allocation2 + $0x28] sm:$0xff]   ;;  %v2081_v52 = vld [vmem:[#allocation2 + $0x30] sm:$0xff]  }
  0x1c   :  { %1647 = vmatpush3.bf16.msra.mxu0 %v1844_v2  ;;  %v2085_v53 = vld [vmem:[#allocation2 + $0x38] sm:$0xff]   ;;  %v1872_v54 = vld [vmem:[#allocation2 + $0xb0] sm:$0xff]   ;;  %v1519_v56 = vld [vmem:[%s2402_s1] ss:$0 sm:$0xff] }
  0x1d   :  { %1648 = vmatprep.subr.bf16.mxu0 %v1845_v3  ;;  %v1873_v55 = vld [vmem:[#allocation2 + $0xb8] sm:$0xff]  }
  0x20   :  { %1649 = vmatpush3.bf16.msra.mxu0 %v1845_v3 }
  0x21   :  { %1650 = vmatprep.subr.bf16.mxu0 %v1846_v5 }
  0x24   :  { %1651 = vmatpush3.bf16.msra.mxu0 %v1846_v5 }
  0x25   :  { %1652 = vmatprep.subr.bf16.mxu0 %v1847_v6 }
  0x28   :  { %1653 = vmatpush3.bf16.msra.mxu0 %v1847_v6 }
  0x29   :  { %1654 = vmatprep.subr.bf16.mxu0 %v1848_v7 }
  0x2c   :  { %1655 = vmatpush3.bf16.msra.mxu0 %v1848_v7 }
  0x2d   :  { %1656 = vmatprep.subr.bf16.mxu0 %v1849_v8 }
  0x30   :  { %1657 = vmatpush3.bf16.msra.mxu0 %v1849_v8 }
  0x31   :  { %1706 = vmatprep.subr.bf16.mxu0 %v1866_v17 }
  0x33   :  { %1659 = vmatmul.mubr.bf16.vlgmr.msra.gmra.mrb[0].mxu0 %v1851_v9 }
  0x34   :  { %1662 = vmatprep.mubr.bf16.mxu0 %v1852_v10  ;;  %1707 = vmatpush3.bf16.msra.mxu0 %v1866_v17 }
  0x35   :  { %1708 = vmatprep.subr.bf16.mxu0 %v1867_v18 }
  0x38   :  { %1709 = vmatpush3.bf16.msra.mxu0 %v1867_v18 }
  0x39   :  { %1710 = vmatprep.subr.bf16.mxu0 %v1868_v19 }
  0x3b   :  { %1663 = vmatmul.mubr.bf16.gmra.mrb[4].mxu0 %v1853_v11 }
  0x3c   :  { %1666 = vmatprep.mubr.bf16.mxu0 %v1854_v12  ;;  %1711 = vmatpush3.bf16.msra.mxu0 %v1868_v19 }
  0x3d   :  { %1712 = vmatprep.subr.bf16.mxu0 %v1869_v20 }
  0x40   :  { %1713 = vmatpush3.bf16.msra.mxu0 %v1869_v20 }
  0x41   :  { %1714 = vmatprep.subr.bf16.mxu0 %v1870_v21 }
  0x43   :  { %1667 = vmatmul.mubr.bf16.gmra.mrb[8].mxu0 %v1855_v13 }
  0x44   :  { %1670 = vmatprep.mubr.bf16.mxu0 %v1856_v14  ;;  %1715 = vmatpush3.bf16.msra.mxu0 %v1870_v21 }
  0x45   :  { %1716 = vmatprep.subr.bf16.mxu0 %v1871_v22 }
  0x48   :  { %1717 = vmatpush3.bf16.msra.mxu0 %v1871_v22 }
  0x49   :  { %1718 = vmatprep.subr.bf16.mxu0 %v1872_v54 }
  0x4b   :  { %1671 = vmatmul.mubr.bf16.gmra.mrb[12].mxu0 %v1857_v15 }
  0x4c   :  { %1719 = vmatpush3.bf16.msra.mxu0 %v1872_v54 }
  0x4d   :  { %1720 = vmatprep.subr.bf16.mxu0 %v1873_v55 }
  0x50   :  { %1721 = vmatpush3.bf16.msra.mxu0 %v1873_v55 }
 0x106   :  { %v1660_v23 = vpop.f32.mrb[0].mxu0 }
 0x107   :  { %v207_v24 = vpop.f32.mrb[1].mxu0 }
 0x108   :  { %v1661_v25 = vpop.f32.mrb[2].mxu0 }
 0x109   :  { %v271_v26 = vpack.c.bf16 %v1661_v25, %v1660_v23  ;;  %v210_v27 = vpop.f32.mrb[3].mxu0 }
 0x10a   :  { %v270_v28 = vpack.c.bf16 %v210_v27, %v207_v24 }
 0x10c   :  { %1674 = vmatprep.subr.bf16.mxu1 %v270_v28 }
 0x10d   :  { %1675 = vmatpush3.bf16.msra.mxu1 %v270_v28 }
 0x10e   :  { %v1664_v29 = vpop.f32.mrb[4].mxu0  ;;  %1676 = vmatprep.subr.bf16.mxu1 %v271_v26 }
 0x10f   :  { %v223_v30 = vpop.f32.mrb[5].mxu0 }
 0x110   :  { %v1665_v31 = vpop.f32.mrb[6].mxu0 }
 0x111   :  { %v273_v32 = vpack.c.bf16 %v1665_v31, %v1664_v29  ;;  %v226_v33 = vpop.f32.mrb[7].mxu0  ;;  %1677 = vmatpush3.bf16.msra.mxu1 %v271_v26 }
 0x112   :  { %v272_v34 = vpack.c.bf16 %v226_v33, %v223_v30 }
 0x114   :  { %1678 = vmatprep.subr.bf16.mxu1 %v272_v34 }
 0x115   :  { %1679 = vmatpush3.bf16.msra.mxu1 %v272_v34 }
 0x116   :  { %v1668_v35 = vpop.f32.mrb[8].mxu0  ;;  %1680 = vmatprep.subr.bf16.mxu1 %v273_v32 }
 0x117   :  { %v239_v36 = vpop.f32.mrb[9].mxu0 }
 0x118   :  { %v1669_v37 = vpop.f32.mrb[10].mxu0 }
 0x119   :  { %v275_v38 = vpack.c.bf16 %v1669_v37, %v1668_v35  ;;  %v242_v39 = vpop.f32.mrb[11].mxu0  ;;  %1681 = vmatpush3.bf16.msra.mxu1 %v273_v32 }
 0x11a   :  { %v274_v40 = vpack.c.bf16 %v242_v39, %v239_v36 }
 0x11c   :  { %1682 = vmatprep.subr.bf16.mxu1 %v274_v40 }
 0x11d   :  { %1683 = vmatpush3.bf16.msra.mxu1 %v274_v40 }
 0x11e   :  { %v1672_v41 = vpop.f32.mrb[12].mxu0  ;;  %1684 = vmatprep.subr.bf16.mxu1 %v275_v38 }
 0x11f   :  { %v255_v42 = vpop.f32.mrb[13].mxu0 }
 0x120   :  { %v1673_v43 = vpop.f32.mrb[14].mxu0 }
 0x121   :  { %v277_v44 = vpack.c.bf16 %v1673_v43, %v1672_v41  ;;  %v258_v45 = vpop.f32.mrb[15].mxu0  ;;  %1685 = vmatpush3.bf16.msra.mxu1 %v275_v38 }
 0x122   :  { %v276_v46 = vpack.c.bf16 %v258_v45, %v255_v42 }
 0x124   :  { %1686 = vmatprep.subr.bf16.mxu1 %v276_v46 }
 0x125   :  { %1687 = vmatpush3.bf16.msra.mxu1 %v276_v46 }
 0x126   :  { %1688 = vmatprep.subr.bf16.mxu1 %v277_v44 }
 0x129   :  { %1689 = vmatpush3.bf16.msra.mxu1 %v277_v44 }
 0x12c   :  { %1691 = vmatmul.mubr.bf16.vlgmr.msra.gmra.mrb[0].mxu1 %v2067_v47 }
 0x12d   :  { %1694 = vmatprep.mubr.bf16.mxu1 %v2069_v48 }
 0x134   :  { %1695 = vmatmul.mubr.bf16.gmra.mrb[4].mxu1 %v2073_v49 }
 0x135   :  { %1698 = vmatprep.mubr.bf16.mxu1 %v2075_v50 }
 0x13c   :  { %1699 = vmatmul.mubr.bf16.gmra.mrb[8].mxu1 %v2079_v51 }
 0x13d   :  { %1702 = vmatprep.mubr.bf16.mxu1 %v2081_v52 }
 0x144   :  { %1703 = vmatmul.mubr.bf16.gmra.mrb[12].mxu1 %v2085_v53 }
 0x145   :  { %1754 = vmatprep.mubr.bf16.mxu1 %v2064_v16 }
 0x1ff   :  { %v1692_v57 = vpop.f32.mrb[0].mxu1 }
 0x200   :  { %v374_v58 = vadd.f32 %v1692_v57, %v1519_v56  ;;  %v365_v59 = vpop.f32.mrb[1].mxu1 }
 0x201   :  { %v366_v60 = vadd.f32 %v1519_v56, %v365_v59  ;;  %v1693_v61 = vpop.f32.mrb[2].mxu1  ;;  %v1875_v59 = vld [vmem:[#allocation2 + $0xc8] sm:$0xff]  }
 0x202   :  { %v377_v62 = vadd.f32 %v1693_v61, %v1519_v56  ;;  %v368_v63 = vpop.f32.mrb[3].mxu1  ;;  %v430_v1 = vmax.f32 %v374_v58, 0.0  ;;  %v1874_v58 = vld [vmem:[#allocation2 + $0xc0] sm:$0xff]   ;;  %v1877_v61 = vld [vmem:[#allocation2 + $0xd8] sm:$0xff]  }
 0x203   :  { %v369_v0 = vadd.f32 %v1519_v56, %v368_v63  ;;  %v428_v3 = vmax.f32 %v366_v60, 0.0  ;;  %1770 = vmatprep.subr.bf16.mxu0 %v1874_v58  ;;  %v1876_v60 = vld [vmem:[#allocation2 + $0xd0] sm:$0xff]  }
 0x204   :  { %v431_v2 = vmax.f32 %v377_v62, 0.0  ;;  %v1879_v62 = vld [vmem:[#allocation2 + $0xe8] sm:$0xff]  }
 0x205   :  { %v429_v4 = vmax.f32 %v369_v0, 0.0 }
 0x206   :  { %v445_v5 = vpack.c.bf16 %v431_v2, %v430_v1 }
 0x207   :  { %v444_v6 = vpack.c.bf16 %v429_v4, %v428_v3  ;;  %v1696_v7 = vpop.f32.mrb[4].mxu1 }
 0x208   :  { %v390_v8 = vadd.f32 %v1696_v7, %v1519_v56  ;;  %v381_v9 = vpop.f32.mrb[5].mxu1 }
 0x209   :  { %v382_v10 = vadd.f32 %v1519_v56, %v381_v9  ;;  %v1697_v11 = vpop.f32.mrb[6].mxu1  ;;  %1722 = vmatprep.mubr.bf16.mxu0 %v444_v6 }
 0x20a   :  { %v393_v12 = vadd.f32 %v1697_v11, %v1519_v56  ;;  %v384_v13 = vpop.f32.mrb[7].mxu1  ;;  %1723 = vmatmul.mubr.bf16.vlgmr.msra.gmra.mrb[16].mxu0 %v445_v5  ;;  %v434_v15 = vmax.f32 %v390_v8, 0.0 }
 0x20b   :  { %v385_v14 = vadd.f32 %v1519_v56, %v384_v13  ;;  %v432_v18 = vmax.f32 %v382_v10, 0.0  ;;  %1771 = vmatpush3.bf16.msra.mxu0 %v1874_v58 }
 0x20c   :  { %v435_v17 = vmax.f32 %v393_v12, 0.0  ;;  %1772 = vmatprep.subr.bf16.mxu0 %v1875_v59 }
 0x20d   :  { %v433_v19 = vmax.f32 %v385_v14, 0.0 }
 0x20e   :  { %v447_v20 = vpack.c.bf16 %v435_v17, %v434_v15 }
 0x20f   :  { %v446_v21 = vpack.c.bf16 %v433_v19, %v432_v18  ;;  %v1700_v22 = vpop.f32.mrb[8].mxu1  ;;  %1773 = vmatpush3.bf16.msra.mxu0 %v1875_v59 }
 0x210   :  { %v406_v23 = vadd.f32 %v1700_v22, %v1519_v56  ;;  %v397_v24 = vpop.f32.mrb[9].mxu1  ;;  %1774 = vmatprep.subr.bf16.mxu0 %v1876_v60 }
 0x211   :  { %v398_v25 = vadd.f32 %v1519_v56, %v397_v24  ;;  %v1701_v26 = vpop.f32.mrb[10].mxu1  ;;  %1726 = vmatprep.mubr.bf16.mxu0 %v446_v21  ;;  %v1880_v24 = vld [vmem:[#allocation2 + $0xf0] sm:$0xff]  }
 0x212   :  { %v409_v27 = vadd.f32 %v1701_v26, %v1519_v56  ;;  %v400_v28 = vpop.f32.mrb[11].mxu1  ;;  %1727 = vmatmul.mubr.bf16.gmra.mrb[20].mxu0 %v447_v20  ;;  %v438_v30 = vmax.f32 %v406_v23, 0.0  ;;  %v1536_v26 = vld [vmem:[%s2402_s1 + $0x1] ss:$0 sm:$0xff] }
 0x213   :  { %v401_v29 = vadd.f32 %v1519_v56, %v400_v28  ;;  %v436_v32 = vmax.f32 %v398_v25, 0.0  ;;  %1775 = vmatpush3.bf16.msra.mxu0 %v1876_v60  ;;  %v1881_v25 = vld [vmem:[#allocation2 + $0xf8] sm:$0xff]  }
 0x214   :  { %v439_v31 = vmax.f32 %v409_v27, 0.0  ;;  %1776 = vmatprep.subr.bf16.mxu0 %v1877_v61 }
 0x215   :  { %v437_v33 = vmax.f32 %v401_v29, 0.0 }
 0x216   :  { %v449_v34 = vpack.c.bf16 %v439_v31, %v438_v30 }
 0x217   :  { %v448_v35 = vpack.c.bf16 %v437_v33, %v436_v32  ;;  %v1704_v36 = vpop.f32.mrb[12].mxu1  ;;  %1777 = vmatpush3.bf16.msra.mxu0 %v1877_v61 }
 0x218   :  { %v422_v37 = vadd.f32 %v1704_v36, %v1519_v56  ;;  %v413_v38 = vpop.f32.mrb[13].mxu1 }
 0x219   :  { %v414_v39 = vadd.f32 %v1519_v56, %v413_v38  ;;  %v1705_v40 = vpop.f32.mrb[14].mxu1  ;;  %1730 = vmatprep.mubr.bf16.mxu0 %v448_v35 }
 0x21a   :  { %v425_v41 = vadd.f32 %v1705_v40, %v1519_v56  ;;  %v416_v42 = vpop.f32.mrb[15].mxu1  ;;  %1731 = vmatmul.mubr.bf16.gmra.mrb[24].mxu0 %v449_v34  ;;  %v442_v44 = vmax.f32 %v422_v37, 0.0 }
 0x21b   :  { %v417_v43 = vadd.f32 %v1519_v56, %v416_v42  ;;  %v440_v46 = vmax.f32 %v414_v39, 0.0  ;;  %v1878_v56 = vld [vmem:[#allocation2 + $0xe0] sm:$0xff]  }
 0x21c   :  { %v443_v45 = vmax.f32 %v425_v41, 0.0  ;;  %1778 = vmatprep.subr.bf16.mxu0 %v1878_v56 }
 0x21d   :  { %v441_v54 = vmax.f32 %v417_v43, 0.0  ;;  %1779 = vmatpush3.bf16.msra.mxu0 %v1878_v56 }
 0x21e   :  { %v451_v55 = vpack.c.bf16 %v443_v45, %v442_v44  ;;  %1780 = vmatprep.subr.bf16.mxu0 %v1879_v62 }
 0x21f   :  { %v450_v57 = vpack.c.bf16 %v441_v54, %v440_v46 }
 0x221   :  { %1734 = vmatprep.mubr.bf16.mxu0 %v450_v57  ;;  %1781 = vmatpush3.bf16.msra.mxu0 %v1879_v62 }
 0x222   :  { %1735 = vmatmul.mubr.bf16.gmra.mrb[28].mxu0 %v451_v55  ;;  %1782 = vmatprep.subr.bf16.mxu0 %v1880_v24 }
 0x225   :  { %1783 = vmatpush3.bf16.msra.mxu0 %v1880_v24 }
 0x226   :  { %1784 = vmatprep.subr.bf16.mxu0 %v1881_v25 }
 0x229   :  { %1785 = vmatpush3.bf16.msra.mxu0 %v1881_v25 }
 0x2dd   :  { %v1724_v63 = vpop.f32.mrb[16].mxu0 }
 0x2de   :  { %v550_v0 = vpop.f32.mrb[17].mxu0 }
 0x2df   :  { %v1725_v1 = vpop.f32.mrb[18].mxu0 }
 0x2e0   :  { %v614_v2 = vpack.c.bf16 %v1725_v1, %v1724_v63  ;;  %v553_v3 = vpop.f32.mrb[19].mxu0 }
 0x2e1   :  { %v613_v4 = vpack.c.bf16 %v553_v3, %v550_v0 }
 0x2e3   :  { %1738 = vmatprep.subr.bf16.mxu1 %v613_v4 }
 0x2e4   :  { %1739 = vmatpush3.bf16.msra.mxu1 %v613_v4 }
 0x2e5   :  { %v1728_v5 = vpop.f32.mrb[20].mxu0  ;;  %1740 = vmatprep.subr.bf16.mxu1 %v614_v2 }
 0x2e6   :  { %v566_v6 = vpop.f32.mrb[21].mxu0 }
 0x2e7   :  { %v1729_v7 = vpop.f32.mrb[22].mxu0 }
 0x2e8   :  { %v616_v8 = vpack.c.bf16 %v1729_v7, %v1728_v5  ;;  %v569_v9 = vpop.f32.mrb[23].mxu0  ;;  %1741 = vmatpush3.bf16.msra.mxu1 %v614_v2 }
 0x2e9   :  { %v615_v10 = vpack.c.bf16 %v569_v9, %v566_v6 }
 0x2eb   :  { %1742 = vmatprep.subr.bf16.mxu1 %v615_v10 }
 0x2ec   :  { %1743 = vmatpush3.bf16.msra.mxu1 %v615_v10 }
 0x2ed   :  { %v1732_v11 = vpop.f32.mrb[24].mxu0  ;;  %1744 = vmatprep.subr.bf16.mxu1 %v616_v8 }
 0x2ee   :  { %v582_v12 = vpop.f32.mrb[25].mxu0 }
 0x2ef   :  { %v1733_v13 = vpop.f32.mrb[26].mxu0 }
 0x2f0   :  { %v618_v14 = vpack.c.bf16 %v1733_v13, %v1732_v11  ;;  %v585_v15 = vpop.f32.mrb[27].mxu0  ;;  %1745 = vmatpush3.bf16.msra.mxu1 %v616_v8 }
 0x2f1   :  { %v617_v17 = vpack.c.bf16 %v585_v15, %v582_v12 }
 0x2f3   :  { %1746 = vmatprep.subr.bf16.mxu1 %v617_v17 }
 0x2f4   :  { %1747 = vmatpush3.bf16.msra.mxu1 %v617_v17 }
 0x2f5   :  { %v1736_v18 = vpop.f32.mrb[28].mxu0  ;;  %1748 = vmatprep.subr.bf16.mxu1 %v618_v14 }
 0x2f6   :  { %v598_v19 = vpop.f32.mrb[29].mxu0 }
 0x2f7   :  { %v1737_v20 = vpop.f32.mrb[30].mxu0 }
 0x2f8   :  { %v620_v21 = vpack.c.bf16 %v1737_v20, %v1736_v18  ;;  %v601_v22 = vpop.f32.mrb[31].mxu0  ;;  %1749 = vmatpush3.bf16.msra.mxu1 %v618_v14 }
 0x2f9   :  { %v619_v23 = vpack.c.bf16 %v601_v22, %v598_v19 }
 0x2fb   :  { %1750 = vmatprep.subr.bf16.mxu1 %v619_v23 }
 0x2fc   :  { %1751 = vmatpush3.bf16.msra.mxu1 %v619_v23 }
 0x2fd   :  { %1752 = vmatprep.subr.bf16.mxu1 %v620_v21 }
 0x300   :  { %1753 = vmatpush3.bf16.msra.mxu1 %v620_v21 }
 0x303   :  { %1755 = vmatmul.mubr.bf16.vlgmr.msra.gmra.mrb[16].mxu1 %v2067_v47 }
 0x304   :  { %1758 = vmatprep.mubr.bf16.mxu1 %v2069_v48 }
 0x30b   :  { %1759 = vmatmul.mubr.bf16.gmra.mrb[20].mxu1 %v2073_v49 }
 0x30c   :  { %1762 = vmatprep.mubr.bf16.mxu1 %v2075_v50 }
 0x313   :  { %1763 = vmatmul.mubr.bf16.gmra.mrb[24].mxu1 %v2079_v51 }
 0x314   :  { %1766 = vmatprep.mubr.bf16.mxu1 %v2081_v52 }
 0x31b   :  { %1767 = vmatmul.mubr.bf16.gmra.mrb[28].mxu1 %v2085_v53 }
 0x31c   :  { %1818 = vmatprep.mubr.bf16.mxu1 %v2064_v16 }
 0x3d6   :  { %v1756_v27 = vpop.f32.mrb[16].mxu1 }
 0x3d7   :  { %v669_v28 = vadd.f32 %v1756_v27, %v1536_v26  ;;  %v660_v29 = vpop.f32.mrb[17].mxu1 }
 0x3d8   :  { %v661_v30 = vadd.f32 %v1536_v26, %v660_v29  ;;  %v1757_v31 = vpop.f32.mrb[18].mxu1 }
 0x3d9   :  { %v672_v32 = vadd.f32 %v1757_v31, %v1536_v26  ;;  %v663_v33 = vpop.f32.mrb[19].mxu1  ;;  %v725_v35 = vmax.f32 %v669_v28, 0.0 }
 0x3da   :  { %v664_v34 = vadd.f32 %v1536_v26, %v663_v33  ;;  %v723_v36 = vmax.f32 %v661_v30, 0.0 }
 0x3db   :  { %v726_v16 = vmax.f32 %v672_v32, 0.0 }
 0x3dc   :  { %v724_v37 = vmax.f32 %v664_v34, 0.0 }
 0x3dd   :  { %v740_v38 = vpack.c.bf16 %v726_v16, %v725_v35 }
 0x3de   :  { %v739_v39 = vpack.c.bf16 %v724_v37, %v723_v36  ;;  %v1760_v40 = vpop.f32.mrb[20].mxu1 }
 0x3df   :  { %v685_v41 = vadd.f32 %v1760_v40, %v1536_v26  ;;  %v676_v42 = vpop.f32.mrb[21].mxu1 }
 0x3e0   :  { %v677_v43 = vadd.f32 %v1536_v26, %v676_v42  ;;  %v1761_v44 = vpop.f32.mrb[22].mxu1  ;;  %1786 = vmatprep.mubr.bf16.mxu0 %v739_v39 }
 0x3e1   :  { %v688_v45 = vadd.f32 %v1761_v44, %v1536_v26  ;;  %v679_v46 = vpop.f32.mrb[23].mxu1  ;;  %1787 = vmatmul.mubr.bf16.vlgmr.msra.gmra.mrb[32].mxu0 %v740_v38  ;;  %v729_v55 = vmax.f32 %v685_v41, 0.0 }
 0x3e2   :  { %v680_v54 = vadd.f32 %v1536_v26, %v679_v46  ;;  %v727_v58 = vmax.f32 %v677_v43, 0.0 }
 0x3e3   :  { %v730_v57 = vmax.f32 %v688_v45, 0.0 }
 0x3e4   :  { %v728_v59 = vmax.f32 %v680_v54, 0.0 }
 0x3e5   :  { %v742_v60 = vpack.c.bf16 %v730_v57, %v729_v55  ;;  %v1545_v57 = vld [vmem:[%s2402_s1 + $0x2] ss:$0 sm:$0xff]  ;;  %s2006_s1 = smov 1  }
 0x3e6   :  { %v741_v61 = vpack.c.bf16 %v728_v59, %v727_v58  ;;  %v1764_v56 = vpop.f32.mrb[24].mxu1 }
 0x3e7   :  { %v701_v62 = vadd.f32 %v1764_v56, %v1536_v26  ;;  %v692_v63 = vpop.f32.mrb[25].mxu1 }
 0x3e8   :  { %v693_v0 = vadd.f32 %v1536_v26, %v692_v63  ;;  %v1765_v1 = vpop.f32.mrb[26].mxu1  ;;  %1790 = vmatprep.mubr.bf16.mxu0 %v741_v61 }
 0x3e9   :  { %v704_v2 = vadd.f32 %v1765_v1, %v1536_v26  ;;  %v695_v3 = vpop.f32.mrb[27].mxu1  ;;  %1791 = vmatmul.mubr.bf16.gmra.mrb[36].mxu0 %v742_v60  ;;  %v733_v5 = vmax.f32 %v701_v62, 0.0 }
 0x3ea   :  { %v696_v4 = vadd.f32 %v1536_v26, %v695_v3  ;;  %v731_v7 = vmax.f32 %v693_v0, 0.0 }
 0x3eb   :  { %v734_v6 = vmax.f32 %v704_v2, 0.0 }
 0x3ec   :  { %v732_v8 = vmax.f32 %v696_v4, 0.0 }
 0x3ed   :  { %v744_v9 = vpack.c.bf16 %v734_v6, %v733_v5 }
 0x3ee   :  { %v743_v10 = vpack.c.bf16 %v732_v8, %v731_v7  ;;  %v1768_v11 = vpop.f32.mrb[28].mxu1 }
 0x3ef   :  { %v717_v12 = vadd.f32 %v1768_v11, %v1536_v26  ;;  %v708_v13 = vpop.f32.mrb[29].mxu1 }
 0x3f0   :  { %v709_v14 = vadd.f32 %v1536_v26, %v708_v13  ;;  %v1769_v15 = vpop.f32.mrb[30].mxu1  ;;  %1794 = vmatprep.mubr.bf16.mxu0 %v743_v10 }
 0x3f1   :  { %v720_v17 = vadd.f32 %v1769_v15, %v1536_v26  ;;  %v711_v18 = vpop.f32.mrb[31].mxu1  ;;  %1795 = vmatmul.mubr.bf16.gmra.mrb[40].mxu0 %v744_v9  ;;  %v737_v20 = vmax.f32 %v717_v12, 0.0 }
 0x3f2   :  { %v712_v19 = vadd.f32 %v1536_v26, %v711_v18  ;;  %v735_v22 = vmax.f32 %v709_v14, 0.0 }
 0x3f3   :  { %v738_v21 = vmax.f32 %v720_v17, 0.0 }
 0x3f4   :  { %v736_v23 = vmax.f32 %v712_v19, 0.0 }
 0x3f5   :  { %v746_v24 = vpack.c.bf16 %v738_v21, %v737_v20 }
 0x3f6   :  { %v745_v25 = vpack.c.bf16 %v736_v23, %v735_v22 }
 0x3f8   :  { %1798 = vmatprep.mubr.bf16.mxu0 %v745_v25 }
 0x3f9   :  { %1799 = vmatmul.mubr.bf16.gmra.mrb[44].mxu0 %v746_v24 }
 0x4b4   :  { %v1788_v27 = vpop.f32.mrb[32].mxu0 }
 0x4b5   :  { %v845_v28 = vpop.f32.mrb[33].mxu0 }
 0x4b6   :  { %v1789_v29 = vpop.f32.mrb[34].mxu0 }
 0x4b7   :  { %v909_v30 = vpack.c.bf16 %v1789_v29, %v1788_v27  ;;  %v848_v31 = vpop.f32.mrb[35].mxu0 }
 0x4b8   :  { %v908_v32 = vpack.c.bf16 %v848_v31, %v845_v28 }
 0x4ba   :  { %1802 = vmatprep.subr.bf16.mxu1 %v908_v32 }
 0x4bb   :  { %1803 = vmatpush3.bf16.msra.mxu1 %v908_v32 }
 0x4bc   :  { %v1792_v33 = vpop.f32.mrb[36].mxu0  ;;  %1804 = vmatprep.subr.bf16.mxu1 %v909_v30 }
 0x4bd   :  { %v861_v34 = vpop.f32.mrb[37].mxu0 }
 0x4be   :  { %v1793_v26 = vpop.f32.mrb[38].mxu0 }
 0x4bf   :  { %v911_v35 = vpack.c.bf16 %v1793_v26, %v1792_v33  ;;  %v864_v16 = vpop.f32.mrb[39].mxu0  ;;  %1805 = vmatpush3.bf16.msra.mxu1 %v909_v30 }
 0x4c0   :  { %v910_v36 = vpack.c.bf16 %v864_v16, %v861_v34 }
 0x4c2   :  { %1806 = vmatprep.subr.bf16.mxu1 %v910_v36 }
 0x4c3   :  { %1807 = vmatpush3.bf16.msra.mxu1 %v910_v36 }
 0x4c4   :  { %v1796_v37 = vpop.f32.mrb[40].mxu0  ;;  %1808 = vmatprep.subr.bf16.mxu1 %v911_v35 }
 0x4c5   :  { %v877_v38 = vpop.f32.mrb[41].mxu0 }
 0x4c6   :  { %v1797_v39 = vpop.f32.mrb[42].mxu0 }
 0x4c7   :  { %v913_v40 = vpack.c.bf16 %v1797_v39, %v1796_v37  ;;  %v880_v41 = vpop.f32.mrb[43].mxu0  ;;  %1809 = vmatpush3.bf16.msra.mxu1 %v911_v35 }
 0x4c8   :  { %v912_v42 = vpack.c.bf16 %v880_v41, %v877_v38 }
 0x4ca   :  { %1810 = vmatprep.subr.bf16.mxu1 %v912_v42 }
 0x4cb   :  { %1811 = vmatpush3.bf16.msra.mxu1 %v912_v42 }
 0x4cc   :  { %v1800_v43 = vpop.f32.mrb[44].mxu0  ;;  %1812 = vmatprep.subr.bf16.mxu1 %v913_v40 }
 0x4cd   :  { %v893_v44 = vpop.f32.mrb[45].mxu0 }
 0x4ce   :  { %v1801_v45 = vpop.f32.mrb[46].mxu0 }
 0x4cf   :  { %v915_v46 = vpack.c.bf16 %v1801_v45, %v1800_v43  ;;  %v896_v54 = vpop.f32.mrb[47].mxu0  ;;  %1813 = vmatpush3.bf16.msra.mxu1 %v913_v40 }
 0x4d0   :  { %v914_v55 = vpack.c.bf16 %v896_v54, %v893_v44 }
 0x4d2   :  { %1814 = vmatprep.subr.bf16.mxu1 %v914_v55 }
 0x4d3   :  { %1815 = vmatpush3.bf16.msra.mxu1 %v914_v55 }
 0x4d4   :  { %1816 = vmatprep.subr.bf16.mxu1 %v915_v46 }
 0x4d7   :  { %1817 = vmatpush3.bf16.msra.mxu1 %v915_v46 }
 0x4da   :  { %1819 = vmatmul.mubr.bf16.vlgmr.msra.gmra.mrb[32].mxu1 %v2067_v47 }
 0x4db   :  { %1822 = vmatprep.mubr.bf16.mxu1 %v2069_v48 }
 0x4e2   :  { %1823 = vmatmul.mubr.bf16.gmra.mrb[36].mxu1 %v2073_v49 }
 0x4e3   :  { %1826 = vmatprep.mubr.bf16.mxu1 %v2075_v50 }
 0x4ea   :  { %1827 = vmatmul.mubr.bf16.gmra.mrb[40].mxu1 %v2079_v51 }
 0x4eb   :  { %1830 = vmatprep.mubr.bf16.mxu1 %v2081_v52 }
 0x4f2   :  { %1831 = vmatmul.mubr.bf16.gmra.mrb[44].mxu1 %v2085_v53 }
 0x5ad   :  { %v1820_v58 = vpop.f32.mrb[32].mxu1 }
 0x5ae   :  { %v2113_v59 = vadd.f32 %v1820_v58, %v1545_v57  ;;  %v955_v47 = vpop.f32.mrb[33].mxu1 }
 0x5af   :  { %v2115_v60 = vadd.f32 %v1545_v57, %v955_v47  ;;  %v1821_v48 = vpop.f32.mrb[34].mxu1 }
 0x5b0   :  { %1038 = vrot.lane.b32.xlu1 %v2113_v59, %s2005_s19  ;;  %v958_v49 = vpop.f32.mrb[35].mxu1  ;;  %v2121_v50 = vadd.f32 %v1821_v48, %v1545_v57 }
 0x5b1   :  { %1034 = vrot.lane.b32.xlu0 %v2115_v60, %s2005_s19  ;;  %v2123_v51 = vadd.f32 %v1545_v57, %v958_v49 }
 0x5b4   :  { %1040 = vrot.lane.b32.xlu1 %v2121_v50, %s2005_s19 }
 0x5b5   :  { %v1824_v52 = vpop.f32.mrb[36].mxu1  ;;  %1036 = vrot.lane.b32.xlu0 %v2123_v51, %s2005_s19 }
 0x5b6   :  { %v2129_v53 = vadd.f32 %v1824_v52, %v1545_v57  ;;  %v971_v61 = vpop.f32.mrb[37].mxu1 }
 0x5b7   :  { %v1825_v56 = vpop.f32.mrb[38].mxu1  ;;  %v2137_v0 = vadd.f32 %v1545_v57, %v971_v61 }
 0x5b8   :  { %v2131_v62 = vadd.f32 %v1825_v56, %v1545_v57  ;;  %v974_v63 = vpop.f32.mrb[39].mxu1 }
 0x5b9   :  { %1046 = vrot.lane.b32.xlu0 %v2129_v53, %s2005_s19  ;;  %v2139_v1 = vadd.f32 %v1545_v57, %v974_v63 }
 0x5ba   :  { %1048 = vrot.lane.b32.xlu1 %v2131_v62, %s2005_s19 }
 0x5bd   :  { %v1828_v2 = vpop.f32.mrb[40].mxu1  ;;  %1042 = vrot.lane.b32.xlu0 %v2137_v0, %s2005_s19 }
 0x5be   :  { %v2143_v3 = vadd.f32 %v1828_v2, %v1545_v57  ;;  %v987_v4 = vpop.f32.mrb[41].mxu1  ;;  %1044 = vrot.lane.b32.xlu1 %v2139_v1, %s2005_s19 }
 0x5bf   :  { %v1829_v5 = vpop.f32.mrb[42].mxu1  ;;  %v2153_v8 = vadd.f32 %v1545_v57, %v987_v4 }
 0x5c0   :  { %v2147_v6 = vadd.f32 %v1829_v5, %v1545_v57  ;;  %v990_v7 = vpop.f32.mrb[43].mxu1 }
 0x5c1   :  { %1054 = vrot.lane.b32.xlu0 %v2143_v3, %s2005_s19  ;;  %v2155_v9 = vadd.f32 %v1545_v57, %v990_v7 }
 0x5c2   :  { %1056 = vrot.lane.b32.xlu1 %v2147_v6, %s2005_s19 }
 0x5c5   :  { %v1832_v10 = vpop.f32.mrb[44].mxu1  ;;  %1050 = vrot.lane.b32.xlu0 %v2153_v8, %s2005_s19 }
 0x5c6   :  { %v1003_v11 = vpop.f32.mrb[45].mxu1  ;;  %1052 = vrot.lane.b32.xlu1 %v2155_v9, %s2005_s19  ;;  %v2167_v17 = vadd.f32 %v1832_v10, %v1545_v57 }
 0x5c7   :  { %v2161_v12 = vadd.f32 %v1545_v57, %v1003_v11  ;;  %v1833_v13 = vpop.f32.mrb[46].mxu1 }
 0x5c8   :  { %v1006_v14 = vpop.f32.mrb[47].mxu1  ;;  %v2171_v18 = vadd.f32 %v1833_v13, %v1545_v57 }
 0x5c9   :  { %v2163_v15 = vadd.f32 %v1545_v57, %v1006_v14  ;;  %1058 = vrot.lane.b32.xlu0 %v2161_v12, %s2005_s19 }
 0x5cb   :  { %1060 = vrot.lane.b32.xlu1 %v2163_v15, %s2005_s19 }
 0x5cd   :  { %1062 = vrot.lane.b32.xlu0 %v2167_v17, %s2005_s19 }
 0x5cf   :  { %1064 = vrot.lane.b32.xlu1 %v2171_v18, %s2005_s19 }
 0x622   :  { %v1039_v19 = vpop.permute.xlu1 %1038 }
 0x623   :  { %v2178_v20 = vmax.f32 %v2113_v59, %v1039_v19  ;;  %v1035_v21 = vpop.permute.xlu0 %1034 }
 0x624   :  { %v2183_v23 = vmax.f32 %v2115_v60, %v1035_v21 }
 0x625   :  { %1166 = vrot.lane.b32.xlu0 %v2178_v20, %s2006_s1 }
 0x626   :  { %v1041_v22 = vpop.permute.xlu1 %1040 }
 0x627   :  { %v2186_v24 = vmax.f32 %v2121_v50, %v1041_v22  ;;  %v1037_v25 = vpop.permute.xlu0 %1036 }
 0x628   :  { %v2193_v27 = vmax.f32 %v2123_v51, %v1037_v25 }
 0x629   :  { %1168 = vrot.lane.b32.xlu1 %v2186_v24, %s2006_s1  ;;  %1162 = vrot.lane.b32.xlu0 %v2183_v23, %s2006_s1 }
 0x62b   :  { %v1047_v28 = vpop.permute.xlu0 %1046 }
 0x62c   :  { %v2196_v29 = vmax.f32 %v2129_v53, %v1047_v28  ;;  %v1049_v30 = vpop.permute.xlu1 %1048 }
 0x62d   :  { %1164 = vrot.lane.b32.xlu1 %v2193_v27, %s2006_s1  ;;  %v2203_v31 = vmax.f32 %v2131_v62, %v1049_v30 }
 0x62e   :  { %1174 = vrot.lane.b32.xlu0 %v2196_v29, %s2006_s1 }
 0x62f   :  { %v1043_v32 = vpop.permute.xlu0 %1042 }
 0x630   :  { %v2206_v33 = vmax.f32 %v2137_v0, %v1043_v32  ;;  %v1045_v34 = vpop.permute.xlu1 %1044 }
 0x631   :  { %1176 = vrot.lane.b32.xlu1 %v2203_v31, %s2006_s1  ;;  %v2213_v26 = vmax.f32 %v2139_v1, %v1045_v34 }
 0x632   :  { %1170 = vrot.lane.b32.xlu0 %v2206_v33, %s2006_s1 }
 0x633   :  { %v1055_v35 = vpop.permute.xlu0 %1054 }
 0x634   :  { %v2216_v16 = vmax.f32 %v2143_v3, %v1055_v35  ;;  %v1057_v36 = vpop.permute.xlu1 %1056 }
 0x635   :  { %1172 = vrot.lane.b32.xlu1 %v2213_v26, %s2006_s1  ;;  %v2223_v37 = vmax.f32 %v2147_v6, %v1057_v36 }
 0x636   :  { %1182 = vrot.lane.b32.xlu0 %v2216_v16, %s2006_s1 }
 0x637   :  { %v1051_v38 = vpop.permute.xlu0 %1050 }
 0x638   :  { %v2226_v39 = vmax.f32 %v2153_v8, %v1051_v38  ;;  %v1053_v40 = vpop.permute.xlu1 %1052 }
 0x639   :  { %1184 = vrot.lane.b32.xlu1 %v2223_v37, %s2006_s1  ;;  %v2233_v41 = vmax.f32 %v2155_v9, %v1053_v40 }
 0x63a   :  { %1178 = vrot.lane.b32.xlu0 %v2226_v39, %s2006_s1 }
 0x63b   :  { %v1059_v42 = vpop.permute.xlu0 %1058 }
 0x63c   :  { %v2236_v43 = vmax.f32 %v2161_v12, %v1059_v42 }
 0x63d   :  { %v1061_v44 = vpop.permute.xlu1 %1060  ;;  %1180 = vrot.lane.b32.xlu1 %v2233_v41, %s2006_s1 }
 0x63e   :  { %v2241_v45 = vmax.f32 %v2163_v15, %v1061_v44  ;;  %1186 = vrot.lane.b32.xlu0 %v2236_v43, %s2006_s1 }
 0x63f   :  { %v1063_v46 = vpop.permute.xlu0 %1062 }
 0x640   :  { %v2246_v54 = vmax.f32 %v2167_v17, %v1063_v46 }
 0x641   :  { %v1065_v55 = vpop.permute.xlu1 %1064  ;;  %1188 = vrot.lane.b32.xlu1 %v2241_v45, %s2006_s1 }
 0x642   :  { %v2251_v57 = vmax.f32 %v2171_v18, %v1065_v55  ;;  %1190 = vrot.lane.b32.xlu0 %v2246_v54, %s2006_s1  ;;  %v2007_v55 = vmov 0  }
 0x643   :  { %1841 = vset.pattern.permute.xlu0 %v2007_v55  ;;  %1840 = vset.pattern.permute.xlu1 %v2007_v55 }
 0x645   :  { %1192 = vrot.lane.b32.xlu1 %v2251_v57, %s2006_s1 }
 0x697   :  { %v1167_v58 = vpop.permute.xlu0 %1166 }
 0x698   :  { %v1212_v47 = vsub.f32 %v2113_v59, %v1167_v58 }
 0x69a   :  { %v1230_v48 = vmul.f32 1.442695, %v1212_v47 }
 0x69b   :  { %v1169_v49 = vpop.permute.xlu1 %1168  ;;  %v1163_v52 = vpop.permute.xlu0 %1162 }
 0x69c   :  { %1882 = vpow2.f32 %v1230_v48  ;;  %v1213_v61 = vsub.f32 %v2121_v50, %v1169_v49  ;;  %v1210_v56 = vsub.f32 %v2115_v60, %v1163_v52 }
 0x69e   :  { %v1232_v63 = vmul.f32 1.442695, %v1213_v61  ;;  %v1226_v2 = vmul.f32 1.442695, %v1210_v56 }
 0x69f   :  { %v1165_v4 = vpop.permute.xlu1 %1164 }
 0x6a0   :  { %1884 = vpow2.f32 %v1232_v63  ;;  %v1211_v5 = vsub.f32 %v2123_v51, %v1165_v4  ;;  %v1175_v7 = vpop.permute.xlu0 %1174 }
 0x6a1   :  { %1886 = vpow2.f32 %v1226_v2  ;;  %v1216_v10 = vsub.f32 %v2129_v53, %v1175_v7 }
 0x6a2   :  { %v1228_v11 = vmul.f32 1.442695, %v1211_v5 }
 0x6a3   :  { %v1238_v13 = vmul.f32 1.442695, %v1216_v10  ;;  %v1177_v14 = vpop.permute.xlu1 %1176 }
 0x6a4   :  { %1888 = vpow2.f32 %v1228_v11  ;;  %v1217_v19 = vsub.f32 %v2131_v62, %v1177_v14  ;;  %v1171_v21 = vpop.permute.xlu0 %1170 }
 0x6a5   :  { %1890 = vpow2.f32 %v1238_v13  ;;  %v1214_v22 = vsub.f32 %v2137_v0, %v1171_v21 }
 0x6a6   :  { %v1883_v25 = vpop.eup %1882  ;;  %v1240_v28 = vmul.f32 1.442695, %v1217_v19 }
 0x6a7   :  { %v1234_v30 = vmul.f32 1.442695, %v1214_v22  ;;  %v1173_v32 = vpop.permute.xlu1 %1172  ;;  %1278 = vrot.lane.b32.xlu0 %v1883_v25, %s2005_s19 }
 0x6a8   :  { %1892 = vpow2.f32 %v1240_v28  ;;  %v1215_v34 = vsub.f32 %v2139_v1, %v1173_v32  ;;  %v1183_v35 = vpop.permute.xlu0 %1182 }
 0x6a9   :  { %1894 = vpow2.f32 %v1234_v30  ;;  %v1220_v36 = vsub.f32 %v2143_v3, %v1183_v35 }
 0x6aa   :  { %v1885_v38 = vpop.eup %1884  ;;  %v1236_v40 = vmul.f32 1.442695, %v1215_v34 }
 0x6ab   :  { %v1887_v42 = vpop.eup %1886  ;;  %v1246_v44 = vmul.f32 1.442695, %v1220_v36  ;;  %1280 = vrot.lane.b32.xlu1 %v1885_v38, %s2005_s19  ;;  %v1185_v46 = vpop.permute.xlu1 %1184 }
 0x6ac   :  { %1896 = vpow2.f32 %v1236_v40  ;;  %v1221_v58 = vsub.f32 %v2147_v6, %v1185_v46  ;;  %1274 = vrot.lane.b32.xlu0 %v1887_v42, %s2005_s19  ;;  %v1179_v47 = vpop.permute.xlu0 %1178 }
 0x6ad   :  { %1898 = vpow2.f32 %v1246_v44  ;;  %v1218_v48 = vsub.f32 %v2153_v8, %v1179_v47  ;;  %v1100_v47 = vsub.f32 %v2113_v59, %v2178_v20 }
 0x6ae   :  { %v1889_v49 = vpop.eup %1888  ;;  %v1248_v52 = vmul.f32 1.442695, %v1221_v58 }
 0x6af   :  { %v1891_v61 = vpop.eup %1890  ;;  %v1242_v56 = vmul.f32 1.442695, %v1218_v48  ;;  %1276 = vrot.lane.b32.xlu1 %v1889_v49, %s2005_s19  ;;  %v1181_v63 = vpop.permute.xlu1 %1180  ;;  %v1118_v48 = vmul.f32 1.442695, %v1100_v47  ;;  %v1101_v49 = vsub.f32 %v2121_v50, %v2186_v24 }
 0x6b0   :  { %1900 = vpow2.f32 %v1248_v52  ;;  %v1219_v2 = vsub.f32 %v2155_v9, %v1181_v63  ;;  %1286 = vrot.lane.b32.xlu0 %v1891_v61, %s2005_s19  ;;  %v1187_v4 = vpop.permute.xlu0 %1186  ;;  %v1098_v52 = vsub.f32 %v2115_v60, %v2183_v23 }
 0x6b1   :  { %1902 = vpow2.f32 %v1242_v56  ;;  %v1222_v5 = vsub.f32 %v2161_v12, %v1187_v4  ;;  %v1120_v61 = vmul.f32 1.442695, %v1101_v49  ;;  %v1099_v56 = vsub.f32 %v2123_v51, %v2193_v27 }
 0x6b2   :  { %v1893_v7 = vpop.eup %1892  ;;  %v1244_v10 = vmul.f32 1.442695, %v1219_v2  ;;  %v1114_v63 = vmul.f32 1.442695, %v1098_v52  ;;  %v1104_v2 = vsub.f32 %v2129_v53, %v2196_v29  ;;  %v1105_v4 = vsub.f32 %v2131_v62, %v2203_v31 }
 0x6b3   :  { %v1895_v11 = vpop.eup %1894  ;;  %v1250_v13 = vmul.f32 1.442695, %v1222_v5  ;;  %1288 = vrot.lane.b32.xlu1 %v1893_v7, %s2005_s19  ;;  %v1189_v14 = vpop.permute.xlu1 %1188  ;;  %v1116_v5 = vmul.f32 1.442695, %v1099_v56  ;;  %v1102_v7 = vsub.f32 %v2137_v0, %v2206_v33 }
 0x6b4   :  { %1904 = vpow2.f32 %v1244_v10  ;;  %v1223_v19 = vsub.f32 %v2163_v15, %v1189_v14  ;;  %1282 = vrot.lane.b32.xlu0 %v1895_v11, %s2005_s19  ;;  %v1191_v21 = vpop.permute.xlu0 %1190  ;;  %v1126_v10 = vmul.f32 1.442695, %v1104_v2  ;;  %v1103_v11 = vsub.f32 %v2139_v1, %v2213_v26 }
 0x6b5   :  { %1906 = vpow2.f32 %v1250_v13  ;;  %v1224_v22 = vsub.f32 %v2167_v17, %v1191_v21  ;;  %v1128_v13 = vmul.f32 1.442695, %v1105_v4  ;;  %v1108_v14 = vsub.f32 %v2143_v3, %v2216_v16 }
 0x6b6   :  { %v1897_v25 = vpop.eup %1896  ;;  %v1252_v28 = vmul.f32 1.442695, %v1223_v19  ;;  %v1122_v19 = vmul.f32 1.442695, %v1102_v7  ;;  %v1109_v21 = vsub.f32 %v2147_v6, %v2223_v37 }
 0x6b7   :  { %v1899_v30 = vpop.eup %1898  ;;  %v1254_v32 = vmul.f32 1.442695, %v1224_v22  ;;  %1284 = vrot.lane.b32.xlu1 %v1897_v25, %s2005_s19  ;;  %v1193_v34 = vpop.permute.xlu1 %1192  ;;  %v1124_v25 = vmul.f32 1.442695, %v1103_v11 }
 0x6b8   :  { %1908 = vpow2.f32 %v1252_v28  ;;  %v1225_v35 = vsub.f32 %v2171_v18, %v1193_v34  ;;  %1294 = vrot.lane.b32.xlu0 %v1899_v30, %s2005_s19  ;;  %v1134_v30 = vmul.f32 1.442695, %v1108_v14 }
 0x6b9   :  { %1910 = vpow2.f32 %v1254_v32  ;;  %v1106_v32 = vsub.f32 %v2153_v8, %v2226_v39 }
 0x6ba   :  { %v1901_v36 = vpop.eup %1900  ;;  %v1256_v38 = vmul.f32 1.442695, %v1225_v35  ;;  %v1136_v35 = vmul.f32 1.442695, %v1109_v21 }
 0x6bb   :  { %v1903_v40 = vpop.eup %1902  ;;  %1296 = vrot.lane.b32.xlu1 %v1901_v36, %s2005_s19  ;;  %v1107_v36 = vsub.f32 %v2155_v9, %v2233_v41 }
 0x6bc   :  { %1912 = vpow2.f32 %v1256_v38  ;;  %1290 = vrot.lane.b32.xlu0 %v1903_v40, %s2005_s19 }
 0x6bd   :  { %1914 = vpow2.f32 %v1118_v48  ;;  %v1132_v47 = vmul.f32 1.442695, %v1107_v36 }
 0x6be   :  { %v1905_v42 = vpop.eup %1904  ;;  %1916 = vpow2.f32 %v1120_v61 }
 0x6bf   :  { %v1907_v44 = vpop.eup %1906  ;;  %1292 = vrot.lane.b32.xlu1 %v1905_v42, %s2005_s19  ;;  %1918 = vpow2.f32 %v1114_v63  ;;  %v1111_v63 = vsub.f32 %v2163_v15, %v2241_v45 }
 0x6c0   :  { %1298 = vrot.lane.b32.xlu0 %v1907_v44, %s2005_s19  ;;  %1920 = vpow2.f32 %v1116_v5  ;;  %v1130_v44 = vmul.f32 1.442695, %v1106_v32  ;;  %v1112_v5 = vsub.f32 %v2167_v17, %v2246_v54 }
 0x6c1   :  { %1922 = vpow2.f32 %v1126_v10 }
 0x6c2   :  { %v1909_v46 = vpop.eup %1908  ;;  %1924 = vpow2.f32 %v1128_v13 }
 0x6c3   :  { %v1911_v55 = vpop.eup %1910  ;;  %1300 = vrot.lane.b32.xlu1 %v1909_v46, %s2005_s19  ;;  %1926 = vpow2.f32 %v1122_v19  ;;  %v1110_v46 = vsub.f32 %v2161_v12, %v2236_v43  ;;  %v1140_v19 = vmul.f32 1.442695, %v1111_v63 }
 0x6c4   :  { %1302 = vrot.lane.b32.xlu0 %v1911_v55, %s2005_s19 }
 0x6c5   :  { %v1138_v56 = vmul.f32 1.442695, %v1110_v46 }
 0x6c6   :  { %v1913_v58 = vpop.eup %1912 }
 0x6c7   :  { %1304 = vrot.lane.b32.xlu1 %v1913_v58, %s2005_s19  ;;  %v1915_v22 = vpop.eup %1914 }
 0x6c8   :  { %v1917_v38 = vpop.eup %1916 }
 0x6c9   :  { %v1919_v42 = vpop.eup %1918 }
 0x6ca   :  { %v1921_v49 = vpop.eup %1920 }
 0x6cb   :  { %v1923_v61 = vpop.eup %1922 }
 0x6cc   :  { %v1925_v10 = vpop.eup %1924 }
 0x6cd   :  { %v1927_v11 = vpop.eup %1926 }
 0x719   :  { %v1279_v28 = vpop.permute.xlu0 %1278 }
 0x71a   :  { %v1324_v34 = vadd.f32 %v1915_v22, %v1279_v28  ;;  %v1142_v28 = vmul.f32 1.442695, %v1112_v5 }
 0x71c   :  { %1928 = vlog2.f32 %v1324_v34 }
 0x71d   :  { %1930 = vpow2.f32 %v1124_v25  ;;  %v1281_v40 = vpop.permute.xlu1 %1280 }
 0x71e   :  { %1932 = vpow2.f32 %v1134_v30  ;;  %v1325_v55 = vadd.f32 %v1917_v38, %v1281_v40  ;;  %v1275_v58 = vpop.permute.xlu0 %1274  ;;  %v1113_v30 = vsub.f32 %v2171_v18, %v2251_v57 }
 0x71f   :  { %1934 = vpow2.f32 %v1136_v35  ;;  %v1322_v48 = vadd.f32 %v1919_v42, %v1275_v58 }
 0x720   :  { %1936 = vlog2.f32 %v1325_v55  ;;  %v1144_v58 = vmul.f32 1.442695, %v1113_v30 }
 0x721   :  { %1938 = vlog2.f32 %v1322_v48  ;;  %v1277_v52 = vpop.permute.xlu1 %1276 }
 0x722   :  { %1940 = vpow2.f32 %v1130_v44  ;;  %v1323_v2 = vadd.f32 %v1921_v49, %v1277_v52  ;;  %v1287_v4 = vpop.permute.xlu0 %1286 }
 0x723   :  { %1942 = vpow2.f32 %v1132_v47  ;;  %v1328_v7 = vadd.f32 %v1923_v61, %v1287_v4 }
 0x724   :  { %1944 = vlog2.f32 %v1323_v2 }
 0x725   :  { %1946 = vlog2.f32 %v1328_v7  ;;  %v1289_v13 = vpop.permute.xlu1 %1288 }
 0x726   :  { %v1929_v14 = vpop.eup %1928  ;;  %1948 = vpow2.f32 %v1138_v56  ;;  %v1329_v21 = vadd.f32 %v1925_v10, %v1289_v13  ;;  %v1283_v22 = vpop.permute.xlu0 %1282 }
 0x727   :  { %v1931_v25 = vpop.eup %1930  ;;  %v1343_v32 = vmul.f32 0.6931472, %v1929_v14  ;;  %v1326_v34 = vadd.f32 %v1927_v11, %v1283_v22 }
 0x728   :  { %v1933_v35 = vpop.eup %1932  ;;  %1950 = vlog2.f32 %v1329_v21 }
 0x729   :  { %v1935_v36 = vpop.eup %1934  ;;  %1952 = vlog2.f32 %v1326_v34  ;;  %v1285_v38 = vpop.permute.xlu1 %1284  ;;  %v1372_v40 = vadd.f32 %v1343_v32, %v2178_v20 }
 0x72a   :  { %v1937_v42 = vpop.eup %1936  ;;  %1954 = vpow2.f32 %v1140_v19  ;;  %v1327_v44 = vadd.f32 %v1931_v25, %v1285_v38  ;;  %v1295_v46 = vpop.permute.xlu0 %1294 }
 0x72b   :  { %v1939_v55 = vpop.eup %1938  ;;  %1956 = vpow2.f32 %v1142_v28  ;;  %v1332_v47 = vadd.f32 %v1933_v35, %v1295_v46  ;;  %1398 = vperm.xlu1 %1840, %v1372_v40   ;;  %v1345_v63 = vmul.f32 0.6931472, %v1937_v42 }
 0x72c   :  { %v1941_v48 = vpop.eup %1940  ;;  %v1339_v49 = vmul.f32 0.6931472, %v1939_v55  ;;  %1958 = vlog2.f32 %v1327_v44 }
 0x72d   :  { %v1943_v52 = vpop.eup %1942  ;;  %1960 = vlog2.f32 %v1332_v47  ;;  %v1297_v61 = vpop.permute.xlu1 %1296  ;;  %v1373_v28 = vadd.f32 %v1345_v63, %v2186_v24 }
 0x72e   :  { %v1945_v56 = vpop.eup %1944  ;;  %v1333_v2 = vadd.f32 %v1935_v36, %v1297_v61  ;;  %v1291_v4 = vpop.permute.xlu0 %1290  ;;  %v1370_v20 = vadd.f32 %v1339_v49, %v2183_v23  ;;  %1962 = vpow2.f32 %v1144_v58 }
 0x72f   :  { %v1947_v5 = vpop.eup %1946  ;;  %v1341_v7 = vmul.f32 0.6931472, %v1945_v56  ;;  %v1330_v10 = vadd.f32 %v1941_v48, %v1291_v4 }
 0x730   :  { %v1949_v11 = vpop.eup %1948  ;;  %1964 = vlog2.f32 %v1333_v2  ;;  %1388 = vperm.xlu0 %1841, %v1370_v20   ;;  %v1351_v13 = vmul.f32 0.6931472, %v1947_v5 }
 0x731   :  { %1966 = vlog2.f32 %v1330_v10  ;;  %v1293_v14 = vpop.permute.xlu1 %1292  ;;  %v1371_v19 = vadd.f32 %v1341_v7, %v2193_v27 }
 0x732   :  { %v1951_v21 = vpop.eup %1950  ;;  %v1331_v22 = vadd.f32 %v1943_v52, %v1293_v14  ;;  %v1299_v25 = vpop.permute.xlu0 %1298  ;;  %v1376_v27 = vadd.f32 %v1351_v13, %v2196_v29 }
 0x733   :  { %v1953_v30 = vpop.eup %1952  ;;  %v1353_v32 = vmul.f32 0.6931472, %v1951_v21  ;;  %v1334_v23 = vadd.f32 %v1949_v11, %v1299_v25  ;;  %1393 = vperm.xlu1 %1840, %v1371_v19  }
 0x734   :  { %v1955_v34 = vpop.eup %1954  ;;  %1968 = vlog2.f32 %v1331_v22  ;;  %1403 = vperm.xlu0 %1841, %v1373_v28   ;;  %v1347_v36 = vmul.f32 0.6931472, %v1953_v30 }
 0x735   :  { %v1957_v35 = vpop.eup %1956  ;;  %1970 = vlog2.f32 %v1334_v23  ;;  %v1301_v38 = vpop.permute.xlu1 %1300  ;;  %v1377_v40 = vadd.f32 %v1353_v32, %v2203_v31 }
 0x736   :  { %v1959_v42 = vpop.eup %1958  ;;  %v1335_v44 = vadd.f32 %v1955_v34, %v1301_v38  ;;  %v1303_v46 = vpop.permute.xlu0 %1302  ;;  %v1374_v61 = vadd.f32 %v1347_v36, %v2206_v33 }
 0x737   :  { %v1961_v55 = vpop.eup %1960  ;;  %v1349_v24 = vmul.f32 0.6931472, %v1959_v42  ;;  %v1336_v58 = vadd.f32 %v1957_v35, %v1303_v46  ;;  %1418 = vperm.xlu1 %1840, %v1376_v27  }
 0x738   :  { %1972 = vlog2.f32 %v1335_v44  ;;  %1423 = vperm.xlu0 %1841, %v1377_v40   ;;  %v1963_v47 = vpop.eup %1962  ;;  %v1359_v48 = vmul.f32 0.6931472, %v1961_v55 }
 0x739   :  { %1974 = vlog2.f32 %v1336_v58  ;;  %v1305_v49 = vpop.permute.xlu1 %1304  ;;  %v1375_v52 = vadd.f32 %v1349_v24, %v2213_v26 }
 0x73a   :  { %v1965_v31 = vpop.eup %1964  ;;  %v1337_v56 = vadd.f32 %v1963_v47, %v1305_v49  ;;  %v1380_v20 = vadd.f32 %v1359_v48, %v2216_v16 }
 0x73b   :  { %v1967_v29 = vpop.eup %1966  ;;  %v1361_v63 = vmul.f32 0.6931472, %v1965_v31  ;;  %1408 = vperm.xlu1 %1840, %v1374_v61  }
 0x73c   :  { %1976 = vlog2.f32 %v1337_v56  ;;  %1413 = vperm.xlu0 %1841, %v1375_v52   ;;  %v1355_v2 = vmul.f32 0.6931472, %v1967_v29 }
 0x73d   :  { %v1381_v4 = vadd.f32 %v1361_v63, %v2223_v37 }
 0x73e   :  { %v1969_v5 = vpop.eup %1968  ;;  %v1378_v11 = vadd.f32 %v1355_v2, %v2226_v39 }
 0x73f   :  { %v1971_v7 = vpop.eup %1970  ;;  %v1357_v10 = vmul.f32 0.6931472, %v1969_v5  ;;  %1438 = vperm.xlu1 %1840, %v1380_v20  }
 0x740   :  { %1443 = vperm.xlu0 %1841, %v1381_v4   ;;  %v1363_v26 = vmul.f32 0.6931472, %v1971_v7 }
 0x741   :  { %v1379_v33 = vadd.f32 %v1357_v10, %v2233_v41 }
 0x742   :  { %v1973_v13 = vpop.eup %1972  ;;  %v1382_v16 = vadd.f32 %v1363_v26, %v2236_v43 }
 0x743   :  { %v1975_v14 = vpop.eup %1974  ;;  %v1365_v19 = vmul.f32 0.6931472, %v1973_v13  ;;  %1428 = vperm.xlu1 %1840, %v1378_v11  }
 0x744   :  { %1433 = vperm.xlu0 %1841, %v1379_v33   ;;  %v1367_v21 = vmul.f32 0.6931472, %v1975_v14 }
 0x745   :  { %v1383_v37 = vadd.f32 %v1365_v19, %v2241_v45 }
 0x746   :  { %v1977_v22 = vpop.eup %1976  ;;  %v1384_v41 = vadd.f32 %v1367_v21, %v2246_v54 }
 0x747   :  { %v1369_v25 = vmul.f32 0.6931472, %v1977_v22  ;;  %1448 = vperm.xlu1 %1840, %v1382_v16  }
 0x748   :  { %1453 = vperm.xlu0 %1841, %v1383_v37  }
 0x749   :  { %v1385_v28 = vadd.f32 %v1369_v25, %v2251_v57 }
 0x74b   :  { %1458 = vperm.xlu1 %1840, %v1384_v41  }
 0x74c   :  { %1463 = vperm.xlu0 %1841, %v1385_v28  }
 0x7aa   :  { %v1399_v39 = vpop.permute.xlu1 %1398 }
 0x7ab   :  { %v1468_v30 = vsub.f32 %v2113_v59, %v1399_v39 }
 0x7ad   :  { %1484 = vst [vmem:[%s2404_s3 + $0x10] sm:$0xff] %v1468_v30 }
 0x7af   :  { %v1389_v45 = vpop.permute.xlu0 %1388 }
 0x7b0   :  { %v1466_v43 = vsub.f32 %v2115_v60, %v1389_v45 }
 0x7b2   :  { %1482 = vst [vmem:[%s2404_s3] sm:$0xff] %v1466_v43  ;;  %v1394_v32 = vpop.permute.xlu1 %1393 }
 0x7b3   :  { %v1467_v57 = vsub.f32 %v2123_v51, %v1394_v32  ;;  %v1404_v54 = vpop.permute.xlu0 %1403 }
 0x7b4   :  { %v1469_v23 = vsub.f32 %v2121_v50, %v1404_v54 }
 0x7b5   :  { %1483 = vst [vmem:[%s2404_s3 + $0x8] sm:$0xff] %v1467_v57 }
 0x7b6   :  { %1485 = vst [vmem:[%s2404_s3 + $0x18] sm:$0xff] %v1469_v23  ;;  %v1419_v59 = vpop.permute.xlu1 %1418 }
 0x7b7   :  { %v1472_v60 = vsub.f32 %v2129_v53, %v1419_v59  ;;  %v1424_v34 = vpop.permute.xlu0 %1423 }
 0x7b8   :  { %v1473_v35 = vsub.f32 %v2131_v62, %v1424_v34 }
 0x7b9   :  { %1488 = vst [vmem:[%s2404_s3 + $0x30] sm:$0xff] %v1472_v60 }
 0x7ba   :  { %1489 = vst [vmem:[%s2404_s3 + $0x38] sm:$0xff] %v1473_v35  ;;  %v1409_v50 = vpop.permute.xlu1 %1408 }
 0x7bb   :  { %v1470_v51 = vsub.f32 %v2137_v0, %v1409_v50  ;;  %v1414_v36 = vpop.permute.xlu0 %1413 }
 0x7bc   :  { %v1471_v38 = vsub.f32 %v2139_v1, %v1414_v36 }
 0x7bd   :  { %1486 = vst [vmem:[%s2404_s3 + $0x20] sm:$0xff] %v1470_v51 }
 0x7be   :  { %1487 = vst [vmem:[%s2404_s3 + $0x28] sm:$0xff] %v1471_v38  ;;  %v1439_v53 = vpop.permute.xlu1 %1438 }
 0x7bf   :  { %v1476_v62 = vsub.f32 %v2143_v3, %v1439_v53  ;;  %v1444_v40 = vpop.permute.xlu0 %1443 }
 0x7c0   :  { %v1477_v27 = vsub.f32 %v2147_v6, %v1444_v40 }
 0x7c1   :  { %1492 = vst [vmem:[%s2404_s3 + $0x50] sm:$0xff] %v1476_v62 }
 0x7c2   :  { %1493 = vst [vmem:[%s2404_s3 + $0x58] sm:$0xff] %v1477_v27  ;;  %v1429_v0 = vpop.permute.xlu1 %1428 }
 0x7c3   :  { %v1474_v1 = vsub.f32 %v2153_v8, %v1429_v0  ;;  %v1434_v42 = vpop.permute.xlu0 %1433 }
 0x7c4   :  { %v1475_v44 = vsub.f32 %v2155_v9, %v1434_v42 }
 0x7c5   :  { %1490 = vst [vmem:[%s2404_s3 + $0x40] sm:$0xff] %v1474_v1 }
 0x7c6   :  { %1491 = vst [vmem:[%s2404_s3 + $0x48] sm:$0xff] %v1475_v44  ;;  %v1449_v3 = vpop.permute.xlu1 %1448 }
 0x7c7   :  { %v1478_v6 = vsub.f32 %v2161_v12, %v1449_v3  ;;  %v1454_v46 = vpop.permute.xlu0 %1453 }
 0x7c8   :  { %v1479_v55 = vsub.f32 %v2163_v15, %v1454_v46 }
 0x7c9   :  { %1494 = vst [vmem:[%s2404_s3 + $0x60] sm:$0xff] %v1478_v6 }
 0x7ca   :  { %1495 = vst [vmem:[%s2404_s3 + $0x68] sm:$0xff] %v1479_v55  ;;  %v1459_v8 = vpop.permute.xlu1 %1458 }
 0x7cb   :  { %v1480_v9 = vsub.f32 %v2167_v17, %v1459_v8  ;;  %v1464_v24 = vpop.permute.xlu0 %1463 }
 0x7cc   :  { %v1481_v58 = vsub.f32 %v2171_v18, %v1464_v24 }
 0x7cd   :  { %1496 = vst [vmem:[%s2404_s3 + $0x70] sm:$0xff] %v1480_v9 }
 0x7ce   :  { %1497 = vst [vmem:[%s2404_s3 + $0x78] sm:$0xff] %v1481_v58 }
 0x7cf   :  { %1502 = vsyncpa [#allocation3], 1 }

</bundles_post_ra>
